<compile_context>
chip_gen: v7x
topology: tpu7x:2x2x1
jax: 0.10.0
libtpu: 0.0.40
codegen_flags: <defaults>
</compile_context>

<pallas_src>
import jax
import jax.numpy as jnp
from jax.experimental import pallas as pl
from jax.experimental.pallas import tpu as pltpu


def _hbm_copy_kernel(x_hbm, o_hbm, sem):
    # Single direct HBM->HBM DMA: no VMEM staging, no tiling, no grid overhead.
    cp = pltpu.make_async_copy(x_hbm, o_hbm, sem)
    cp.start()
    cp.wait()


def _pallas_identity_copy(x):
    return pl.pallas_call(
        _hbm_copy_kernel,
        out_shape=jax.ShapeDtypeStruct(x.shape, x.dtype),
        in_specs=[pl.BlockSpec(memory_space=pl.ANY)],   # leave input in HBM
        out_specs=pl.BlockSpec(memory_space=pl.ANY),    # leave output in HBM
        scratch_shapes=[pltpu.SemaphoreType.DMA],       # DMA-completion semaphore
        # Zero-FLOP, pure-bandwidth op: read nbytes + write nbytes.
        cost_estimate=pl.CostEstimate(
            flops=0, transcendentals=0, bytes_accessed=2 * x.nbytes),
    )(x)


def phi_rotary_embedding_forward(x, use_pallas=False):
    """Forward of PhiRotaryEmbedding (identity).

    use_pallas=False (default): return x directly — the fastest correct
        implementation (zero HBM traffic, zero launch overhead).
    use_pallas=True: run the identity as one direct HBM->HBM DMA copy via
        Pallas, for cases where an explicit on-device pass is required.
    """
    if not use_pallas:
        return x
    if x.size == 0:
        return x
    return _pallas_identity_copy(x)


class PhiRotaryEmbedding:
    """JAX/Pallas counterpart of the PyTorch module (no learnable params)."""

    def __init__(self, dim, use_pallas=False):
        self.dim = dim            # unused in forward, kept for parity with PyTorch
        self.use_pallas = use_pallas

    def __call__(self, x):
        return phi_rotary_embedding_forward(x, use_pallas=self.use_pallas)


if __name__ == "__main__":
    key = jax.random.PRNGKey(0)
    B, S, D = 2, 8, 32  # small shapes consistent with a rotary-embedding input
    x = jax.random.normal(key, (B, S, D), dtype=jnp.float32)

    # Explicit on-device pass: single HBM->HBM DMA through Pallas.
    module = PhiRotaryEmbedding(dim=D, use_pallas=True)
    y = jax.block_until_ready(module(x))
    assert y.shape == x.shape and y.dtype == x.dtype
    assert bool(jnp.array_equal(y, x))

    # Also check it works for an awkward (non-128-multiple, bf16) shape.
    x2 = jax.random.normal(jax.random.PRNGKey(1), (3, 7, 5), dtype=jnp.bfloat16)
    y2 = jax.block_until_ready(phi_rotary_embedding_forward(x2, use_pallas=True))
    assert bool(jnp.array_equal(y2, x2))

    # Default / recommended production path: identity with zero HBM traffic.
    y_fast = jax.block_until_ready(phi_rotary_embedding_forward(x))
    assert bool(jnp.array_equal(y_fast, x))

    print("KERNEL_OK")
</pallas_src>

<mosaic_0001>
module attributes {stable_mosaic.version = 11 : i64} {
  func.func @_hbm_copy_kernel(%arg0: memref<2x8x32xf32, #tpu.memory_space<any>>, %arg1: memref<2x8x32xf32, #tpu.memory_space<any>>, %arg2: memref<!tpu.dma_semaphore, #tpu.memory_space<semaphore_mem>>) attributes {dimension_semantics = [], scalar_prefetch = 0 : i64, scratch_operands = 1 : i64, tpu.core_type = #tpu.core_type<tc>} {
    tpu.enqueue_dma source(%arg0 : memref<2x8x32xf32, #tpu.memory_space<any>>) target(%arg1 : memref<2x8x32xf32, #tpu.memory_space<any>>) target_semaphore(%arg2 : memref<!tpu.dma_semaphore, #tpu.memory_space<semaphore_mem>>)
    tpu.wait_dma2 semaphore(%arg2 : memref<!tpu.dma_semaphore, #tpu.memory_space<semaphore_mem>>) src(%arg0 : memref<2x8x32xf32, #tpu.memory_space<any>>) dst(%arg1 : memref<2x8x32xf32, #tpu.memory_space<any>>)
    return
  }
}

</mosaic_0001>

<bundles_post_ra>
// kernel: tpu_custom_call.1
= control target key start
LH: loop header
LB: loop body
LE: loop exit
PB: predicated region body
PF: predicated region fallthrough
CT: control target
= control target key end

     0   :  { %s35_s6 = smov [#allocation2]   ;;  %s36_s7 = smov [#allocation3]   ;;  %s54_s0 = inlined_call_operand.hbm [shape: f32[2,8,32], index: 0, kind: input, shape index: {}]   ;;  %s55_s1 = inlined_call_operand.hbm [shape: f32[2,8,32], index: 1, kind: output, shape index: {}]  }
   0x1   :  { %s37_s8 = smov 0  }
   0x2   :  { %18 = dma.general %s54_s0, 256, %s55_s1, %s35_s6, %s36_s7, [#allocation4], %s37_s8, 0  }
   0x3   :  { %33 = dma.done.wait [#allocation2], 256 }
   0x4   :  { %34 = vsyncadd [#allocation2], 4294967040 }
   0x5   :  { %23 = vsyncmov [#allocation2] }
   0x8   :  { %s24_s13 = vpop.sfrf %23 }
   0x9   :  { %p29_p0 = scmp.ne.s32.totalorder %s24_s13, 0 }
   0xb   :  { %28 = shalt.err (%p29_p0)  }

</bundles_post_ra>
